<compile_context>
chip_gen: v6e
topology: v6e:2x2x1
jax: 0.10.0
libtpu: 0.0.40
codegen_flags: <defaults>
</compile_context>

<pallas_src>
import functools

import jax
import jax.numpy as jnp
from jax.experimental import pallas as pl
from jax.experimental.pallas import tpu as pltpu

LEAKY_SLOPE = 0.2
GN_EPS = 1e-5


def _fused_double_conv_kernel(x_ref, w1_ref, a1_ref, w2_ref, a2_ref, gmat_ref,
                              o_ref, pad1_ref, pad2_ref, *, H, W, Cin, Cout):
    # x_ref:    (1, H, W*Cin)        bf16 lane-packed input (one batch element)
    # w1_ref:   (3, W*Cin,  W*Cout)  bf16 banded conv1 weights (one matrix per ky tap,
    #                                horizontal boundary folded in)
    # a1_ref:   (3, W*Cout)          f32 rows: conv bias, GN gamma, GN beta (lane-tiled)
    # w2_ref:   (3, W*Cout, W*Cout)  bf16 banded conv2 weights
    # a2_ref:   (3, W*Cout)          f32
    # gmat_ref: (W*Cout, W*Cout)     f32 group-averaging matrix (1/(H*W*cpg) within group)
    # o_ref:    (1, H, W*Cout)       f32 lane-dense packed output
    # pad1_ref: (H+2, W*Cin)         bf16 VMEM scratch, vertical halo only
    # pad2_ref: (H+2, W*Cout)        bf16 VMEM scratch, vertical halo only
    WC = W * Cout
    WCin = W * Cin

    def conv_gn_lrelu(pad_ref, w_ref, aff_ref):
        # 3x3 conv (pad=1, stride=1) as 3 banded bf16 matmuls, one per vertical tap.
        acc = jnp.dot(pad_ref[pl.ds(0, H), :], w_ref[0],
                      preferred_element_type=jnp.float32)
        for ky in (1, 2):
            acc = acc + jnp.dot(pad_ref[pl.ds(ky, H), :], w_ref[ky],
                                preferred_element_type=jnp.float32)
        acc = acc + aff_ref[0:1, :]                               # conv bias

        # GroupNorm stats (f32): E[x], E[x^2] per group via one fused matmul with
        # the block-diagonal averaging matrix.
        stats = jnp.concatenate(
            [jnp.sum(acc, axis=0, keepdims=True),
             jnp.sum(acc * acc, axis=0, keepdims=True)], axis=0)  # (2, WC)
        stats = jnp.dot(stats, gmat_ref[...], preferred_element_type=jnp.float32)
        mean = stats[0:1, :]
        var = jnp.maximum(stats[1:2, :] - mean * mean, 0.0)
        inv = jax.lax.rsqrt(var + GN_EPS)
        y = (acc - mean) * inv * aff_ref[1:2, :] + aff_ref[2:3, :]
        # LeakyReLU(0.2)
        return jnp.where(y >= 0, y, LEAKY_SLOPE * y)

    # Zero only the vertical halo rows (interior rows are fully overwritten below).
    pad1_ref[pl.ds(0, 1), :] = jnp.zeros((1, WCin), pad1_ref.dtype)
    pad1_ref[pl.ds(H + 1, 1), :] = jnp.zeros((1, WCin), pad1_ref.dtype)
    pad2_ref[pl.ds(0, 1), :] = jnp.zeros((1, WC), pad2_ref.dtype)
    pad2_ref[pl.ds(H + 1, 1), :] = jnp.zeros((1, WC), pad2_ref.dtype)

    # ---- stage 1: lane-aligned interior store, conv + GN + LeakyReLU ----
    pad1_ref[pl.ds(1, H), :] = x_ref[0]
    y1 = conv_gn_lrelu(pad1_ref, w1_ref, a1_ref)                  # f32 (H, WC)

    # ---- stage 2: intermediate stays in VMEM (no HBM round trip) ----
    pad2_ref[pl.ds(1, H), :] = y1.astype(pad2_ref.dtype)
    y2 = conv_gn_lrelu(pad2_ref, w2_ref, a2_ref)

    o_ref[...] = y2.reshape(1, H, WC)


def _band_weights(w_hwio, W_img):
    """(3,3,Cin,Cout) HWIO weights -> (3, W*Cin, W*Cout) banded matrices.

    band[ky][(j+kx-1)*Cin + ci, j*Cout + co] = w[ky, kx, ci, co] for valid source
    columns; the horizontal zero-pad boundary is folded in by dropping the
    out-of-range shift entries (jnp.eye with offset).
    """
    kh, kw, _, _ = w_hwio.shape
    mats = []
    for ky in range(kh):
        m = sum(jnp.kron(jnp.eye(W_img, k=1 - kx, dtype=jnp.float32),
                         w_hwio[ky, kx].astype(jnp.float32))
                for kx in range(kw))
        mats.append(m)
    return jnp.stack(mats)                                        # (3, W*Cin, W*Cout)


def double_conv2d_nhwc(x_nhwc, params):
    """NHWC-native forward pass (preferred entry point: no layout transposes)."""
    N, H, W, Cin = x_nhwc.shape
    Cout = params["w1"].shape[-1]
    groups = params["groups"]
    cpg = Cout // groups
    WC = W * Cout
    WCin = W * Cin

    # Lane-packed bf16 input: (N, H, W*Cin).  Reshape is free in XLA.
    x = x_nhwc.reshape(N, H, WCin).astype(jnp.bfloat16)

    w1b = _band_weights(params["w1"], W).astype(jnp.bfloat16)     # (3, WCin, WC)
    w2b = _band_weights(params["w2"], W).astype(jnp.bfloat16)     # (3, WC,   WC)
    a1 = jnp.stack([jnp.tile(params["b1"], W),
                    jnp.tile(params["gamma1"], W),
                    jnp.tile(params["beta1"], W)]).astype(jnp.float32)   # (3, WC)
    a2 = jnp.stack([jnp.tile(params["b2"], W),
                    jnp.tile(params["gamma2"], W),
                    jnp.tile(params["beta2"], W)]).astype(jnp.float32)   # (3, WC)

    # Block-diagonal group-averaging matrix: gmat[l, l'] = 1/(H*W*cpg) if the
    # channels of lanes l and l' are in the same GroupNorm group, else 0.
    grp = (jnp.arange(WC) % Cout) // cpg
    gmat = (grp[:, None] == grp[None, :]).astype(jnp.float32) / float(H * W * cpg)

    kernel = functools.partial(_fused_double_conv_kernel, H=H, W=W, Cin=Cin, Cout=Cout)
    # Grid-invariant operands: fully resident in VMEM, single buffer (no pipelining).
    resident = lambda: pl.BlockSpec(memory_space=pltpu.MemorySpace.VMEM)

    out = pl.pallas_call(
        kernel,
        out_shape=jax.ShapeDtypeStruct((N, H, WC), jnp.float32),
        grid_spec=pltpu.PrefetchScalarGridSpec(
            num_scalar_prefetch=0,
            grid=(N,),
            in_specs=[
                pl.BlockSpec((1, H, WCin), lambda n: (n, 0, 0)),
                resident(),   # w1b
                resident(),   # a1
                resident(),   # w2b
                resident(),   # a2
                resident(),   # gmat
            ],
            out_specs=pl.BlockSpec((1, H, WC), lambda n: (n, 0, 0)),
            scratch_shapes=[
                pltpu.VMEM((H + 2, WCin), jnp.bfloat16),
                pltpu.VMEM((H + 2, WC), jnp.bfloat16),
            ],
        ),
        compiler_params=pltpu.CompilerParams(dimension_semantics=("parallel",)),
    )(x, w1b, a1, w2b, a2, gmat)

    return out.reshape(N, H, W, Cout)


def double_conv2d(x_nchw, params):
    """NCHW convenience wrapper matching the PyTorch module interface.

    NOTE: the NCHW<->NHWC transposes are full HBM passes; keep the surrounding
    model NHWC and call double_conv2d_nhwc directly to avoid them.
    """
    x_nhwc = jnp.transpose(x_nchw, (0, 2, 3, 1)).astype(jnp.float32)
    out_nhwc = double_conv2d_nhwc(x_nhwc, params)
    return jnp.transpose(out_nhwc, (0, 3, 1, 2))


def double_conv2d_reference(x_nchw, params):
    """Pure-JAX f32 reference mirroring the PyTorch module exactly (NCHW)."""
    def conv(x, w_hwio, b):
        y = jax.lax.conv_general_dilated(
            x, w_hwio, window_strides=(1, 1), padding=((1, 1), (1, 1)),
            dimension_numbers=("NCHW", "HWIO", "NCHW"))
        return y + b[None, :, None, None]

    def gn(x, gamma, beta, groups):
        N, C, H, W = x.shape
        xg = x.reshape(N, groups, C // groups, H, W)
        mean = xg.mean(axis=(2, 3, 4), keepdims=True)
        var = ((xg - mean) ** 2).mean(axis=(2, 3, 4), keepdims=True)
        xn = ((xg - mean) / jnp.sqrt(var + GN_EPS)).reshape(N, C, H, W)
        return xn * gamma[None, :, None, None] + beta[None, :, None, None]

    def lrelu(x):
        return jnp.where(x >= 0, x, LEAKY_SLOPE * x)

    y = lrelu(gn(conv(x_nchw, params["w1"], params["b1"]),
                 params["gamma1"], params["beta1"], params["groups"]))
    y = lrelu(gn(conv(y, params["w2"], params["b2"]),
                 params["gamma2"], params["beta2"], params["groups"]))
    return y


def init_params(key, in_channels, out_channels):
    ks = jax.random.split(key, 8)
    return {
        "groups": out_channels // 4,
        "w1": 0.1 * jax.random.normal(ks[0], (3, 3, in_channels, out_channels), jnp.float32),
        "b1": 0.1 * jax.random.normal(ks[1], (out_channels,), jnp.float32),
        "gamma1": 1.0 + 0.1 * jax.random.normal(ks[2], (out_channels,), jnp.float32),
        "beta1": 0.1 * jax.random.normal(ks[3], (out_channels,), jnp.float32),
        "w2": 0.1 * jax.random.normal(ks[4], (3, 3, out_channels, out_channels), jnp.float32),
        "b2": 0.1 * jax.random.normal(ks[5], (out_channels,), jnp.float32),
        "gamma2": 1.0 + 0.1 * jax.random.normal(ks[6], (out_channels,), jnp.float32),
        "beta2": 0.1 * jax.random.normal(ks[7], (out_channels,), jnp.float32),
    }


if __name__ == "__main__":
    key = jax.random.PRNGKey(0)
    k_x, k_p = jax.random.split(key)

    N, Cin, H, W = 2, 4, 16, 16
    Cout = 8  # must be divisible by 4 (GroupNorm(out_channels // 4, out_channels))

    x = jax.random.normal(k_x, (N, Cin, H, W), jnp.float32)
    params = init_params(k_p, Cin, Cout)

    out = jax.block_until_ready(double_conv2d(x, params))
    ref = jax.block_until_ready(double_conv2d_reference(x, params))

    assert out.shape == (N, Cout, H, W)
    # bf16 MXU operands (f32 accumulation / f32 GN stats): tolerance sized for
    # two stacked bf16 convs + GroupNorm on ~unit-scale activations.
    err = float(jnp.max(jnp.abs(out - ref)))
    assert jnp.allclose(out, ref, atol=6e-2, rtol=6e-2), err

    print("KERNEL_OK")
</pallas_src>

<mosaic_0001>
module attributes {stable_mosaic.version = 11 : i64} {
  func.func @_fused_double_conv_kernel(%arg0: i32, %arg1: memref<1x16x64xbf16, #tpu.memory_space<vmem>>, %arg2: memref<3x64x128xbf16, #tpu.memory_space<vmem>>, %arg3: memref<3x128xf32, #tpu.memory_space<vmem>>, %arg4: memref<3x128x128xbf16, #tpu.memory_space<vmem>>, %arg5: memref<3x128xf32, #tpu.memory_space<vmem>>, %arg6: memref<128x128xf32, #tpu.memory_space<vmem>>, %arg7: memref<1x16x128xf32, #tpu.memory_space<vmem>>, %arg8: memref<18x64xbf16, #tpu.memory_space<vmem>>, %arg9: memref<18x128xbf16, #tpu.memory_space<vmem>>) attributes {dimension_semantics = [#tpu.dimension_semantics<parallel>], iteration_bounds = array<i64: 2>, scalar_prefetch = 0 : i64, scratch_operands = 2 : i64, tpu.core_type = #tpu.core_type<tc>, window_params = [{transform_indices = @transform_0, window_bounds = array<i64: 1, 16, 64>}, {pipeline_mode = #tpu.pipeline_mode<synchronous>, transform_indices = @transform_1, window_bounds = array<i64: 3, 64, 128>}, {pipeline_mode = #tpu.pipeline_mode<synchronous>, transform_indices = @transform_2, window_bounds = array<i64: 3, 128>}, {pipeline_mode = #tpu.pipeline_mode<synchronous>, transform_indices = @transform_3, window_bounds = array<i64: 3, 128, 128>}, {pipeline_mode = #tpu.pipeline_mode<synchronous>, transform_indices = @transform_4, window_bounds = array<i64: 3, 128>}, {pipeline_mode = #tpu.pipeline_mode<synchronous>, transform_indices = @transform_5, window_bounds = array<i64: 128, 128>}, {transform_indices = @transform_6, window_bounds = array<i64: 1, 16, 128>}]} {
    %cst = arith.constant 0.000000e+00 : bf16
    %0 = vector.broadcast %cst : bf16 to vector<1x64xbf16>
    %c0 = arith.constant 0 : index
    %c0_0 = arith.constant 0 : index
    %1 = vector.load %arg8[%c0, %c0_0] : memref<18x64xbf16, #tpu.memory_space<vmem>>, vector<1x64xbf16>
    tpu.vector_store %arg8[%c0, %c0_0], %0 {strides = array<i32>} : memref<18x64xbf16, #tpu.memory_space<vmem>>, vector<1x64xbf16>,
    %cst_1 = arith.constant 0.000000e+00 : bf16
    %2 = vector.broadcast %cst_1 : bf16 to vector<1x64xbf16>
    %c17 = arith.constant 17 : index
    %c0_2 = arith.constant 0 : index
    %3 = vector.load %arg8[%c17, %c0_2] : memref<18x64xbf16, #tpu.memory_space<vmem>>, vector<1x64xbf16>
    tpu.vector_store %arg8[%c17, %c0_2], %2 {strides = array<i32>} : memref<18x64xbf16, #tpu.memory_space<vmem>>, vector<1x64xbf16>,
    %cst_3 = arith.constant 0.000000e+00 : bf16
    %4 = vector.broadcast %cst_3 : bf16 to vector<1x128xbf16>
    %c0_4 = arith.constant 0 : index
    %c0_5 = arith.constant 0 : index
    %5 = vector.load %arg9[%c0_4, %c0_5] : memref<18x128xbf16, #tpu.memory_space<vmem>>, vector<1x128xbf16>
    tpu.vector_store %arg9[%c0_4, %c0_5], %4 {strides = array<i32>} : memref<18x128xbf16, #tpu.memory_space<vmem>>, vector<1x128xbf16>,
    %cst_6 = arith.constant 0.000000e+00 : bf16
    %6 = vector.broadcast %cst_6 : bf16 to vector<1x128xbf16>
    %c17_7 = arith.constant 17 : index
    %c0_8 = arith.constant 0 : index
    %7 = vector.load %arg9[%c17_7, %c0_8] : memref<18x128xbf16, #tpu.memory_space<vmem>>, vector<1x128xbf16>
    tpu.vector_store %arg9[%c17_7, %c0_8], %6 {strides = array<i32>} : memref<18x128xbf16, #tpu.memory_space<vmem>>, vector<1x128xbf16>,
    %c0_9 = arith.constant 0 : index
    %c0_10 = arith.constant 0 : index
    %c0_11 = arith.constant 0 : index
    %8 = vector.load %arg1[%c0_9, %c0_10, %c0_11] : memref<1x16x64xbf16, #tpu.memory_space<vmem>>, vector<1x16x64xbf16>
    %9 = vector.shape_cast %8 : vector<1x16x64xbf16> to vector<16x64xbf16>
    %c1 = arith.constant 1 : index
    %c0_12 = arith.constant 0 : index
    %10 = vector.load %arg8[%c1, %c0_12] : memref<18x64xbf16, #tpu.memory_space<vmem>>, vector<16x64xbf16>
    tpu.vector_store %arg8[%c1, %c0_12], %9 {strides = array<i32>} : memref<18x64xbf16, #tpu.memory_space<vmem>>, vector<16x64xbf16>,
    %c0_13 = arith.constant 0 : index
    %c0_14 = arith.constant 0 : index
    %11 = vector.load %arg8[%c0_13, %c0_14] : memref<18x64xbf16, #tpu.memory_space<vmem>>, vector<16x64xbf16>
    %c0_15 = arith.constant 0 : index
    %c0_16 = arith.constant 0 : index
    %c0_17 = arith.constant 0 : index
    %12 = vector.load %arg2[%c0_15, %c0_16, %c0_17] : memref<3x64x128xbf16, #tpu.memory_space<vmem>>, vector<1x64x128xbf16>
    %13 = vector.shape_cast %12 : vector<1x64x128xbf16> to vector<64x128xbf16>
    %cst_18 = arith.constant dense<0.000000e+00> : vector<16x128xf32>
    %14 = tpu.matmul %11, %13, %cst_18 {dimension_numbers = #tpu.dot_dimension_numbers<[1], [0], [0], [1], [0, 0, 1, 1], [], []>} : vector<16x64xbf16>, vector<64x128xbf16>, vector<16x128xf32> -> vector<16x128xf32>
    %c1_19 = arith.constant 1 : index
    %c0_20 = arith.constant 0 : index
    %15 = vector.load %arg8[%c1_19, %c0_20] : memref<18x64xbf16, #tpu.memory_space<vmem>>, vector<16x64xbf16>
    %c1_21 = arith.constant 1 : index
    %c0_22 = arith.constant 0 : index
    %c0_23 = arith.constant 0 : index
    %16 = vector.load %arg2[%c1_21, %c0_22, %c0_23] : memref<3x64x128xbf16, #tpu.memory_space<vmem>>, vector<1x64x128xbf16>
    %17 = vector.shape_cast %16 : vector<1x64x128xbf16> to vector<64x128xbf16>
    %cst_24 = arith.constant dense<0.000000e+00> : vector<16x128xf32>
    %18 = tpu.matmul %15, %17, %cst_24 {dimension_numbers = #tpu.dot_dimension_numbers<[1], [0], [0], [1], [0, 0, 1, 1], [], []>} : vector<16x64xbf16>, vector<64x128xbf16>, vector<16x128xf32> -> vector<16x128xf32>
    %19 = arith.addf %14, %18 : vector<16x128xf32>
    %c2 = arith.constant 2 : index
    %c0_25 = arith.constant 0 : index
    %20 = vector.load %arg8[%c2, %c0_25] : memref<18x64xbf16, #tpu.memory_space<vmem>>, vector<16x64xbf16>
    %c2_26 = arith.constant 2 : index
    %c0_27 = arith.constant 0 : index
    %c0_28 = arith.constant 0 : index
    %21 = vector.load %arg2[%c2_26, %c0_27, %c0_28] : memref<3x64x128xbf16, #tpu.memory_space<vmem>>, vector<1x64x128xbf16>
    %22 = vector.shape_cast %21 : vector<1x64x128xbf16> to vector<64x128xbf16>
    %cst_29 = arith.constant dense<0.000000e+00> : vector<16x128xf32>
    %23 = tpu.matmul %20, %22, %cst_29 {dimension_numbers = #tpu.dot_dimension_numbers<[1], [0], [0], [1], [0, 0, 1, 1], [], []>} : vector<16x64xbf16>, vector<64x128xbf16>, vector<16x128xf32> -> vector<16x128xf32>
    %24 = arith.addf %19, %23 : vector<16x128xf32>
    %c0_30 = arith.constant 0 : index
    %c0_31 = arith.constant 0 : index
    %25 = vector.load %arg3[%c0_30, %c0_31] : memref<3x128xf32, #tpu.memory_space<vmem>>, vector<1x128xf32>
    %26 = vector.broadcast %25 : vector<1x128xf32> to vector<16x128xf32>
    %27 = arith.addf %24, %26 : vector<16x128xf32>
    %cst_32 = arith.constant dense<0.000000e+00> : vector<128xf32>
    %28 = vector.multi_reduction <add>, %27, %cst_32 [0] : vector<16x128xf32> to vector<128xf32>
    %29 = vector.shape_cast %28 : vector<128xf32> to vector<1x128xf32>
    %30 = arith.mulf %27, %27 : vector<16x128xf32>
    %cst_33 = arith.constant dense<0.000000e+00> : vector<128xf32>
    %31 = vector.multi_reduction <add>, %30, %cst_33 [0] : vector<16x128xf32> to vector<128xf32>
    %32 = vector.shape_cast %31 : vector<128xf32> to vector<1x128xf32>
    %33 = tpu.concatenate %29, %32 in 0 : vector<1x128xf32>, vector<1x128xf32> -> vector<2x128xf32>
    %c0_34 = arith.constant 0 : index
    %c0_35 = arith.constant 0 : index
    %34 = vector.load %arg6[%c0_34, %c0_35] : memref<128x128xf32, #tpu.memory_space<vmem>>, vector<128x128xf32>
    %cst_36 = arith.constant dense<0.000000e+00> : vector<2x128xf32>
    %35 = tpu.matmul %33, %34, %cst_36 {dimension_numbers = #tpu.dot_dimension_numbers<[1], [0], [0], [1], [0, 0, 1, 1], [], []>} : vector<2x128xf32>, vector<128x128xf32>, vector<2x128xf32> -> vector<2x128xf32>
    %36 = vector.extract_strided_slice %35 {offsets = [0, 0], sizes = [1, 128], strides = [1, 1]} : vector<2x128xf32> to vector<1x128xf32>
    %37 = vector.extract_strided_slice %35 {offsets = [1, 0], sizes = [1, 128], strides = [1, 1]} : vector<2x128xf32> to vector<1x128xf32>
    %38 = arith.mulf %36, %36 : vector<1x128xf32>
    %39 = arith.subf %37, %38 : vector<1x128xf32>
    %cst_37 = arith.constant 0.000000e+00 : f32
    %40 = vector.broadcast %cst_37 : f32 to vector<1x128xf32>
    %41 = arith.maximumf %39, %40 : vector<1x128xf32>
    %cst_38 = arith.constant 9.99999974E-6 : f32
    %42 = vector.broadcast %cst_38 : f32 to vector<1x128xf32>
    %43 = arith.addf %41, %42 : vector<1x128xf32>
    %44 = math.rsqrt %43 : vector<1x128xf32>
    %45 = vector.broadcast %36 : vector<1x128xf32> to vector<16x128xf32>
    %46 = arith.subf %27, %45 : vector<16x128xf32>
    %47 = vector.broadcast %44 : vector<1x128xf32> to vector<16x128xf32>
    %48 = arith.mulf %46, %47 : vector<16x128xf32>
    %c1_39 = arith.constant 1 : index
    %c0_40 = arith.constant 0 : index
    %49 = vector.load %arg3[%c1_39, %c0_40] : memref<3x128xf32, #tpu.memory_space<vmem>>, vector<1x128xf32>
    %50 = vector.broadcast %49 : vector<1x128xf32> to vector<16x128xf32>
    %51 = arith.mulf %48, %50 : vector<16x128xf32>
    %c2_41 = arith.constant 2 : index
    %c0_42 = arith.constant 0 : index
    %52 = vector.load %arg3[%c2_41, %c0_42] : memref<3x128xf32, #tpu.memory_space<vmem>>, vector<1x128xf32>
    %53 = vector.broadcast %52 : vector<1x128xf32> to vector<16x128xf32>
    %54 = arith.addf %51, %53 : vector<16x128xf32>
    %cst_43 = arith.constant 0.000000e+00 : f32
    %55 = vector.broadcast %cst_43 : f32 to vector<16x128xf32>
    %56 = arith.cmpf oge, %54, %55 : vector<16x128xf32>
    %cst_44 = arith.constant 2.000000e-01 : f32
    %57 = vector.broadcast %cst_44 : f32 to vector<16x128xf32>
    %58 = arith.mulf %57, %54 : vector<16x128xf32>
    %59 = arith.select %56, %54, %58 : vector<16x128xi1>, vector<16x128xf32>
    %60 = arith.truncf %59 : vector<16x128xf32> to vector<16x128xbf16>
    %c1_45 = arith.constant 1 : index
    %c0_46 = arith.constant 0 : index
    %61 = vector.load %arg9[%c1_45, %c0_46] : memref<18x128xbf16, #tpu.memory_space<vmem>>, vector<16x128xbf16>
    tpu.vector_store %arg9[%c1_45, %c0_46], %60 {strides = array<i32>} : memref<18x128xbf16, #tpu.memory_space<vmem>>, vector<16x128xbf16>,
    %c0_47 = arith.constant 0 : index
    %c0_48 = arith.constant 0 : index
    %62 = vector.load %arg9[%c0_47, %c0_48] : memref<18x128xbf16, #tpu.memory_space<vmem>>, vector<16x128xbf16>
    %c0_49 = arith.constant 0 : index
    %c0_50 = arith.constant 0 : index
    %c0_51 = arith.constant 0 : index
    %63 = vector.load %arg4[%c0_49, %c0_50, %c0_51] : memref<3x128x128xbf16, #tpu.memory_space<vmem>>, vector<1x128x128xbf16>
    %64 = vector.shape_cast %63 : vector<1x128x128xbf16> to vector<128x128xbf16>
    %cst_52 = arith.constant dense<0.000000e+00> : vector<16x128xf32>
    %65 = tpu.matmul %62, %64, %cst_52 {dimension_numbers = #tpu.dot_dimension_numbers<[1], [0], [0], [1], [0, 0, 1, 1], [], []>} : vector<16x128xbf16>, vector<128x128xbf16>, vector<16x128xf32> -> vector<16x128xf32>
    %c1_53 = arith.constant 1 : index
    %c0_54 = arith.constant 0 : index
    %66 = vector.load %arg9[%c1_53, %c0_54] : memref<18x128xbf16, #tpu.memory_space<vmem>>, vector<16x128xbf16>
    %c1_55 = arith.constant 1 : index
    %c0_56 = arith.constant 0 : index
    %c0_57 = arith.constant 0 : index
    %67 = vector.load %arg4[%c1_55, %c0_56, %c0_57] : memref<3x128x128xbf16, #tpu.memory_space<vmem>>, vector<1x128x128xbf16>
    %68 = vector.shape_cast %67 : vector<1x128x128xbf16> to vector<128x128xbf16>
    %cst_58 = arith.constant dense<0.000000e+00> : vector<16x128xf32>
    %69 = tpu.matmul %66, %68, %cst_58 {dimension_numbers = #tpu.dot_dimension_numbers<[1], [0], [0], [1], [0, 0, 1, 1], [], []>} : vector<16x128xbf16>, vector<128x128xbf16>, vector<16x128xf32> -> vector<16x128xf32>
    %70 = arith.addf %65, %69 : vector<16x128xf32>
    %c2_59 = arith.constant 2 : index
    %c0_60 = arith.constant 0 : index
    %71 = vector.load %arg9[%c2_59, %c0_60] : memref<18x128xbf16, #tpu.memory_space<vmem>>, vector<16x128xbf16>
    %c2_61 = arith.constant 2 : index
    %c0_62 = arith.constant 0 : index
    %c0_63 = arith.constant 0 : index
    %72 = vector.load %arg4[%c2_61, %c0_62, %c0_63] : memref<3x128x128xbf16, #tpu.memory_space<vmem>>, vector<1x128x128xbf16>
    %73 = vector.shape_cast %72 : vector<1x128x128xbf16> to vector<128x128xbf16>
    %cst_64 = arith.constant dense<0.000000e+00> : vector<16x128xf32>
    %74 = tpu.matmul %71, %73, %cst_64 {dimension_numbers = #tpu.dot_dimension_numbers<[1], [0], [0], [1], [0, 0, 1, 1], [], []>} : vector<16x128xbf16>, vector<128x128xbf16>, vector<16x128xf32> -> vector<16x128xf32>
    %75 = arith.addf %70, %74 : vector<16x128xf32>
    %c0_65 = arith.constant 0 : index
    %c0_66 = arith.constant 0 : index
    %76 = vector.load %arg5[%c0_65, %c0_66] : memref<3x128xf32, #tpu.memory_space<vmem>>, vector<1x128xf32>
    %77 = vector.broadcast %76 : vector<1x128xf32> to vector<16x128xf32>
    %78 = arith.addf %75, %77 : vector<16x128xf32>
    %cst_67 = arith.constant dense<0.000000e+00> : vector<128xf32>
    %79 = vector.multi_reduction <add>, %78, %cst_67 [0] : vector<16x128xf32> to vector<128xf32>
    %80 = vector.shape_cast %79 : vector<128xf32> to vector<1x128xf32>
    %81 = arith.mulf %78, %78 : vector<16x128xf32>
    %cst_68 = arith.constant dense<0.000000e+00> : vector<128xf32>
    %82 = vector.multi_reduction <add>, %81, %cst_68 [0] : vector<16x128xf32> to vector<128xf32>
    %83 = vector.shape_cast %82 : vector<128xf32> to vector<1x128xf32>
    %84 = tpu.concatenate %80, %83 in 0 : vector<1x128xf32>, vector<1x128xf32> -> vector<2x128xf32>
    %c0_69 = arith.constant 0 : index
    %c0_70 = arith.constant 0 : index
    %85 = vector.load %arg6[%c0_69, %c0_70] : memref<128x128xf32, #tpu.memory_space<vmem>>, vector<128x128xf32>
    %cst_71 = arith.constant dense<0.000000e+00> : vector<2x128xf32>
    %86 = tpu.matmul %84, %85, %cst_71 {dimension_numbers = #tpu.dot_dimension_numbers<[1], [0], [0], [1], [0, 0, 1, 1], [], []>} : vector<2x128xf32>, vector<128x128xf32>, vector<2x128xf32> -> vector<2x128xf32>
    %87 = vector.extract_strided_slice %86 {offsets = [0, 0], sizes = [1, 128], strides = [1, 1]} : vector<2x128xf32> to vector<1x128xf32>
    %88 = vector.extract_strided_slice %86 {offsets = [1, 0], sizes = [1, 128], strides = [1, 1]} : vector<2x128xf32> to vector<1x128xf32>
    %89 = arith.mulf %87, %87 : vector<1x128xf32>
    %90 = arith.subf %88, %89 : vector<1x128xf32>
    %cst_72 = arith.constant 0.000000e+00 : f32
    %91 = vector.broadcast %cst_72 : f32 to vector<1x128xf32>
    %92 = arith.maximumf %90, %91 : vector<1x128xf32>
    %cst_73 = arith.constant 9.99999974E-6 : f32
    %93 = vector.broadcast %cst_73 : f32 to vector<1x128xf32>
    %94 = arith.addf %92, %93 : vector<1x128xf32>
    %95 = math.rsqrt %94 : vector<1x128xf32>
    %96 = vector.broadcast %87 : vector<1x128xf32> to vector<16x128xf32>
    %97 = arith.subf %78, %96 : vector<16x128xf32>
    %98 = vector.broadcast %95 : vector<1x128xf32> to vector<16x128xf32>
    %99 = arith.mulf %97, %98 : vector<16x128xf32>
    %c1_74 = arith.constant 1 : index
    %c0_75 = arith.constant 0 : index
    %100 = vector.load %arg5[%c1_74, %c0_75] : memref<3x128xf32, #tpu.memory_space<vmem>>, vector<1x128xf32>
    %101 = vector.broadcast %100 : vector<1x128xf32> to vector<16x128xf32>
    %102 = arith.mulf %99, %101 : vector<16x128xf32>
    %c2_76 = arith.constant 2 : index
    %c0_77 = arith.constant 0 : index
    %103 = vector.load %arg5[%c2_76, %c0_77] : memref<3x128xf32, #tpu.memory_space<vmem>>, vector<1x128xf32>
    %104 = vector.broadcast %103 : vector<1x128xf32> to vector<16x128xf32>
    %105 = arith.addf %102, %104 : vector<16x128xf32>
    %cst_78 = arith.constant 0.000000e+00 : f32
    %106 = vector.broadcast %cst_78 : f32 to vector<16x128xf32>
    %107 = arith.cmpf oge, %105, %106 : vector<16x128xf32>
    %cst_79 = arith.constant 2.000000e-01 : f32
    %108 = vector.broadcast %cst_79 : f32 to vector<16x128xf32>
    %109 = arith.mulf %108, %105 : vector<16x128xf32>
    %110 = arith.select %107, %105, %109 : vector<16x128xi1>, vector<16x128xf32>
    %111 = vector.shape_cast %110 : vector<16x128xf32> to vector<1x16x128xf32>
    %c0_80 = arith.constant 0 : index
    %c0_81 = arith.constant 0 : index
    %c0_82 = arith.constant 0 : index
    %112 = vector.load %arg7[%c0_80, %c0_81, %c0_82] : memref<1x16x128xf32, #tpu.memory_space<vmem>>, vector<1x16x128xf32>
    tpu.vector_store %arg7[%c0_80, %c0_81, %c0_82], %111 {strides = array<i32>} : memref<1x16x128xf32, #tpu.memory_space<vmem>>, vector<1x16x128xf32>,
    return
  }
  func.func @transform_0(%arg0: i32) -> (i32, i32, i32) {
    %c0_i32 = arith.constant 0 : i32
    %c0_i32_0 = arith.constant 0 : i32
    %c0_i32_1 = arith.constant 0 : i32
    return %arg0, %c0_i32, %c0_i32_0 : i32, i32, i32
  }
  func.func @transform_1(%arg0: i32) -> (i32, i32, i32) {
    %c0_i32 = arith.constant 0 : i32
    %c0_i32_0 = arith.constant 0 : i32
    %c0_i32_1 = arith.constant 0 : i32
    %c0_i32_2 = arith.constant 0 : i32
    return %c0_i32, %c0_i32_0, %c0_i32_1 : i32, i32, i32
  }
  func.func @transform_2(%arg0: i32) -> (i32, i32) {
    %c0_i32 = arith.constant 0 : i32
    %c0_i32_0 = arith.constant 0 : i32
    %c0_i32_1 = arith.constant 0 : i32
    return %c0_i32, %c0_i32_0 : i32, i32
  }
  func.func @transform_3(%arg0: i32) -> (i32, i32, i32) {
    %c0_i32 = arith.constant 0 : i32
    %c0_i32_0 = arith.constant 0 : i32
    %c0_i32_1 = arith.constant 0 : i32
    %c0_i32_2 = arith.constant 0 : i32
    return %c0_i32, %c0_i32_0, %c0_i32_1 : i32, i32, i32
  }
  func.func @transform_4(%arg0: i32) -> (i32, i32) {
    %c0_i32 = arith.constant 0 : i32
    %c0_i32_0 = arith.constant 0 : i32
    %c0_i32_1 = arith.constant 0 : i32
    return %c0_i32, %c0_i32_0 : i32, i32
  }
  func.func @transform_5(%arg0: i32) -> (i32, i32) {
    %c0_i32 = arith.constant 0 : i32
    %c0_i32_0 = arith.constant 0 : i32
    %c0_i32_1 = arith.constant 0 : i32
    return %c0_i32, %c0_i32_0 : i32, i32
  }
  func.func @transform_6(%arg0: i32) -> (i32, i32, i32) {
    %c0_i32 = arith.constant 0 : i32
    %c0_i32_0 = arith.constant 0 : i32
    %c0_i32_1 = arith.constant 0 : i32
    return %arg0, %c0_i32, %c0_i32_0 : i32, i32, i32
  }
}

</mosaic_0001>

<bundles_post_ra>
// kernel: tpu_custom_call.1
= control target key start
LH: loop header
LB: loop body
LE: loop exit
PB: predicated region body
PF: predicated region fallthrough
CT: control target
= control target key end

     0   :  { %11 = vsyncpa [#allocation5], 0  ;;  %s2639_s0 = inlined_call_operand.hbm [shape: bf16[2,16,64], index: 0, kind: input, shape index: {}]   ;;  %s2640_s1 = inlined_call_operand.hbm [shape: bf16[3,64,128], index: 1, kind: input, shape index: {}]   ;;  %s2641_s2 = inlined_call_operand.hbm [shape: f32[3,128], index: 2, kind: input, shape index: {}]   ;;  %s2642_s3 = inlined_call_operand.hbm [shape: bf16[3,128,128], index: 3, kind: input, shape index: {}]   ;;  %s2643_s4 = inlined_call_operand.vmem [shape: f32[3,128], index: 4, kind: input, shape index: {}]   ;;  %s2644_s5 = inlined_call_operand.hbm [shape: f32[128,128], index: 5, kind: input, shape index: {}]   ;;  %s2645_s6 = inlined_call_operand.hbm [shape: f32[2,16,128], index: 6, kind: output, shape index: {}]  }
   0x1   :  { %13 = vsyncpa [#allocation5 + $0x1], 0 }
   0x2   :  { %14 = vsyncpa [#allocation8], 0 }
   0x3   :  { %15 = vsyncpa [#allocation11], 0 }
   0x4   :  { %16 = vsyncpa [#allocation6], 0 }
   0x5   :  { %18 = vsyncpa [#allocation6 + $0x1], 0  ;;  %s2177_s21 = smov 0   ;;  %s2179_s22 = smov 0  }
   0x6   :  { %s2181_s23 = smov 0   ;;  %s2183_s24 = smov 0  }
   0x7 LB: > { %s2198_s25 = sadd.s32 4294967295, %s2126_s24   ;;  %s1460_s26 = sadd.s32 4294967294, %s2126_s24   ;;  %s2126_s24 = sphi %s2183_s24, %s2681_s24   ;;  %s2122_s23 = sphi %s2181_s23, %s2680_s23   ;;  %s2118_s22 = sphi %s2179_s22, %s2679_s22   ;;  %s2114_s21 = sphi %s2177_s21, %s2678_s21  }
   0x8   : > { %p44_p0 = scmp.ne.s32.totalorder %s2118_s22, %s2114_s21  ;;  %p2646_p1 = scmp.eq.s32.totalorder %s2198_s25, 0 }
   0x9   : > { %p179_p3 = scmp.eq.s32.totalorder %s1460_s26, 1  ;;  %p1461_p5 = scmp.ge.s32.totalorder %s2126_s24, 1 }
   0xa   : > { %p2207_p4 = por %p2646_p1, %p44_p0  ;;  %p186_p7 = scmp.lt.s32.totalorder %s2126_s24, 3 }
   0xb   : > { %p2212_p6 = por %p179_p3, %p44_p0  ;;  %s2128_s30 = smov [#allocation7]  }
   0xc   : > { %s2652_s27 = scalar_select %p2207_p4, 1, 0 }
   0xd   : > { %s2653_s28 = scalar_select %p2212_p6, 1, 0 }
   0xe   : > { %p2217_p8 = pnand %p1461_p5, %p186_p7  ;;  %s198_s7 = sshll.u32 %s2128_s30, 4  ;;  %s199_s7 = int_to_ptr.vmem [resolvable:$true] %s198_s7 }
   0xf   : > { %s2129_s9 = smov [#allocation10]   ;;  %s2130_s11 = smov [#allocation9]  }
  0x10   : > { %s2654_s29 = scalar_select %p2217_p8, 1, 0 }
  0x11   : > { %p1801_p9 = pneg %p2217_p8  ;;  %s222_s10 = sshll.u32 %s2129_s9, 4  ;;  %s223_s10 = int_to_ptr.vmem [resolvable:$true] %s222_s10 }
  0x12   : > { %s212_s12 = sshll.u32 %s2130_s11, 4  ;;  %s1933_s13 = scalar_lea.vmem %s199_s7, 1536  ;;  %s213_s12 = int_to_ptr.vmem [resolvable:$true] %s212_s12 }
  0x13   : > { %p2226_p11 = pnand %p1801_p9, %p2646_p1  ;;  %p1934_p13 = scmp.ne.s32.totalorder %s199_s7, %s1933_s13 }
  0x14   : > { %p1941_p5 = scmp.lt.s32.totalorder %s199_s7, %s199_s7  ;;  %p1942_p7 = scmp.lt.s32.totalorder %s1933_s13, %s1933_s13 }
  0x15   : > { %p1924_p12 = pneg %p2226_p11 }
  0x16   : > { %p1943_p9 = por %p1942_p7, %p1941_p5 }
  0x17   : > { %p1936_p0 = pnand %p1934_p13, %p1924_p12 }
  0x19   : > { %p1937_p3 = pneg %p1936_p0 }
  0x1b   : > { %p1944_p10 = pnand %p1943_p9, %p1937_p3 }
  0x1d   : > { %1947 = shalt.err (!%p1944_p10)
}
  0x1e   : > { %s2647_s14 = smov 64   ;;  %s2648_s15 = smov 4  }
  0x1f   : > { %1804 = dma.hbm_to_vmem [thread:$0]  (!%p2226_p11), %s2640_s1, 1536, %s199_s7, [#allocation8], %s2647_s14, %s2647_s14, %s2648_s15  }
  0x20   : > { %s1959_s18 = scalar_lea.vmem %s223_s10, 3072  ;;  %p1967_p3 = scmp.lt.s32.totalorder %s223_s10, %s223_s10 }
  0x21   : > { %p1960_p13 = scmp.ne.s32.totalorder %s223_s10, %s1959_s18  ;;  %p1968_p10 = scmp.lt.s32.totalorder %s1959_s18, %s1959_s18 }
  0x23   : > { %p1962_p0 = pnand %p1960_p13, %p1924_p12  ;;  %p1969_p7 = por %p1968_p10, %p1967_p3 }
  0x25   : > { %p1963_p5 = pneg %p1962_p0 }
  0x27   : > { %p1970_p9 = pnand %p1969_p7, %p1963_p5 }
  0x29   : > { %1973 = shalt.err (!%p1970_p9)
}
  0x2a   : > { %1810 = dma.hbm_to_vmem [thread:$0]  (!%p2226_p11), %s2642_s3, 3072, %s223_s10, [#allocation11], %s2647_s14, %s2647_s14, %s2648_s15  }
  0x2b   : > { %s1985_s26 = scalar_lea.vmem %s213_s12, 64  ;;  %p1993_p3 = scmp.lt.s32.totalorder %s213_s12, %s213_s12 }
  0x2c   : > { %p1986_p1 = scmp.ne.s32.totalorder %s213_s12, %s1985_s26  ;;  %p1994_p5 = scmp.lt.s32.totalorder %s1985_s26, %s1985_s26 }
  0x2e   : > { %p1988_p13 = pnand %p1986_p1, %p1924_p12  ;;  %p1995_p10 = por %p1994_p5, %p1993_p3 }
  0x30   : > { %p1989_p0 = pneg %p1988_p13 }
  0x32   : > { %p1996_p7 = pnand %p1995_p10, %p1989_p0 }
  0x34   : > { %1999 = shalt.err (!%p1996_p7)
}
  0x35   : > { %1807 = dma.hbm_to_vmem [thread:$0]  (!%p2226_p11), %s2641_s2, 64, %s213_s12, [#allocation8]  }
  0x36   : > { %s2133_s9 = smov [#allocation12]  }
  0x37   : > { %s238_s10 = sshll.u32 %s2133_s9, 4  ;;  %s239_s10 = int_to_ptr.vmem [resolvable:$true] %s238_s10 }
  0x38   : > { %s2011_s11 = scalar_lea.vmem %s239_s10, 2048  ;;  %p2019_p2 = scmp.lt.s32.totalorder %s239_s10, %s239_s10 }
  0x39   : > { %p2012_p9 = scmp.ne.s32.totalorder %s239_s10, %s2011_s11  ;;  %p2020_p3 = scmp.lt.s32.totalorder %s2011_s11, %s2011_s11 }
  0x3b   : > { %p2014_p1 = pnand %p2012_p9, %p1924_p12  ;;  %p2021_p0 = por %p2020_p3, %p2019_p2 }
  0x3d   : > { %p2015_p13 = pneg %p2014_p1 }
  0x3f   : > { %p2022_p5 = pnand %p2021_p0, %p2015_p13 }
  0x41   : > { %2025 = shalt.err (!%p2022_p5)
}
  0x42   : > { %s2134_s13 = smov 128   ;;  %s2135_s12 = smov 8  }
  0x43   : > { %1813 = dma.hbm_to_vmem [thread:$0]  (!%p2226_p11), %s2644_s5, 2048, %s239_s10, [#allocation11], %s2134_s13, %s2134_s13, %s2135_s12  }
  0x44   : > { %s2271_s18 = sadd.s32 1, %s2126_s24   ;;  %s31_s20 = sadd.s32 1, %s2122_s23 }
  0x45   : > { %s28_s19 = ssub.s32 %s2126_s24, %s2271_s18  ;;  %p38_p12 = scmp.ne.s32.totalorder %s2122_s23, %s2118_s22 }
  0x46   : > { %p29_p2 = scmp.eq.s32.totalorder %s28_s19, 0  ;;  %p39_p10 = scmp.eq.s32.totalorder %s2126_s24, 0 }
  0x47   : > { %p2656_p9 = scmp.eq.s32.totalorder %s2198_s25, 1  ;;  %p1826_p13 = scmp.lt.s32.totalorder %s2126_s24, 2 }
  0x48   : > { %s2280_s26 = scalar_select %p29_p2, %s2122_s23, %s31_s20  }
  0x49   : > { %p40_p7 = por %p39_p10, %p38_p12  ;;  %p2284_p1 = por %p2656_p9, %p38_p12 }
  0x4a   : > { %s252_s8 = sand.u32 1, %s2122_s23   ;;  %s1535_s9 = sshll.u32 %s2126_s24, 7 }
  0x4b   : > { %s2657_s30 = scalar_select %p2284_p1, 1, 0 }
  0x4c   : > { %s1467_s7 = sshll.u32 %s252_s8, 3  ;;  %s2294_s13 = scalar_lea.hbm %s2639_s0, %s1535_s9 }
  0x4d   : > { %s256_s12 = scalar_lea.vmem [#allocation4], %s1467_s7  ;;  %p2298_p11 = pnand %p1826_p13, %p40_p7 }
  0x4e   : > { %s263_s16 = sshll.u32 %s256_s12, 4  ;;  %s2302_s19 = scalar_lea.sflag [#allocation5], %s252_s8  ;;  %s2296_s16 = int_to_ptr.vmem [resolvable:$true] %s263_s16 }
  0x4f   : > { %s2026_s20 = scalar_lea.hbm %s2294_s13, 128  ;;  %p2028_p0 = pneg %p2298_p11 }
  0x50   : > { %p2027_p3 = scmp.ne.s32.totalorder %s2294_s13, %s2026_s20  ;;  %s2031_s7 = scalar_lea.hbm %s2639_s0, 256 }
  0x51   : > { %p2032_p12 = scmp.lt.s32.totalorder %s2294_s13, %s2639_s0  ;;  %p2033_p10 = scmp.lt.s32.totalorder %s2031_s7, %s2026_s20 }
  0x52   : > { %p2029_p5 = pnand %p2028_p0, %p2027_p3 }
  0x53   : > { %p2034_p7 = por %p2033_p10, %p2032_p12 }
  0x54   : > { %p2030_p2 = pneg %p2029_p5 }
  0x56   : > { %p2035_p9 = pnand %p2034_p7, %p2030_p2 }
  0x58   : > { %2038 = shalt.err (!%p2035_p9)
}
  0x59   : > { %s2039_s8 = scalar_lea.vmem %s2296_s16, 128  ;;  %s2136_s14 = smov [#allocation4]  }
  0x5a   : > { %p2040_p13 = scmp.ne.s32.totalorder %s2296_s16, %s2039_s8  ;;  %s2044_s15 = sshll.u32 %s2136_s14, 4  ;;  %s2045_s15 = int_to_ptr.vmem [resolvable:$false] %s2044_s15 }
  0x5b   : > { %s2046_s9 = scalar_lea.vmem %s2045_s15, 256  ;;  %p2047_p5 = scmp.lt.s32.totalorder %s2296_s16, %s2045_s15 }
  0x5c   : > { %p2042_p6 = pnand %p2040_p13, %p2028_p0  ;;  %p2048_p1 = scmp.lt.s32.totalorder %s2046_s9, %s2039_s8 }
  0x5e   : > { %p2043_p3 = pneg %p2042_p6  ;;  %p2049_p4 = por %p2048_p1, %p2047_p5 }
  0x60   : > { %p2050_p8 = pnand %p2049_p4, %p2043_p3 }
  0x62   : > { %2053 = shalt.err (!%p2050_p8)
}
  0x63   : > { %s2659_s20 = smov 4   ;;  %s2660_s10 = smov 64  }
  0x64   : > { %1817 = dma.hbm_to_vmem [thread:$0]  (!%p2298_p11), %s2294_s13, 128, %s2296_s16, %s2302_s19, %s2660_s10, %s2660_s10, %s2659_s20  }
  0x65   : > { %p2661_p6 = scmp.ne.s32.totalorder %s2654_s29, 0 }
  0x66   : > { %s2329_s14 = sand.u32 (!%p2661_p6), 1, %s2118_s22   ;;  %p2662_p4 = scmp.ne.s32.totalorder (!%p2661_p6), %s2652_s27, 0 }
  0x67   : > { %275 = sbr.rel (%p2661_p6) target bundleno = 1128 (0x468), region = 44  ;;  %s1471_s15 = sshll.u32 (!%p2661_p6), %s2329_s14, 3 }
  0x68   : > { %s278_s7 = scalar_lea.sflag (!%p2661_p6), [#allocation5], %s2329_s14  ;;  %s2333_s11 = scalar_lea.vmem (!%p2661_p6), [#allocation4], %s1471_s15 }
  0x6c   : > { %2097 = dma.done.wait (%p2662_p4), %s278_s7, 128  }
  0x6d   : > { %2099 = vsyncadd (%p2662_p4), %s278_s7, 4294967168  ;;  %p2663_p8 = scmp.eq.s32.totalorder %s2198_s25, 0 }
  0x6f   : > { %2101 = dma.done.wait (%p2663_p8), [#allocation8], 1600   ;;  %p2664_p1 = pmov %p2663_p8 }
  0x71   : > { %2103 = vsyncadd (%p2664_p1), [#allocation8], 4294965696  ;;  %p2665_p11 = pmov %p2664_p1 }
  0x72   : > { %p2666_p0 = pmov %p2664_p1 }
  0x73   : > { %2105 = dma.done.wait (%p2665_p11), [#allocation11], 5120  }
  0x74   : > { %2107 = vsyncadd (%p2666_p0), [#allocation11], 4294962176  ;;  %v2137_v0 = vmov 0.0   ;;  %vm2138_vm0 = vmmov 0   ;;  %vm328_vm1 = vsmask.f32 256 }
  0x75   : > { %1615 = vmatprep.subr.bf16.mxu0 %v2137_v0  ;;  %1627 = vmatprep.subr.bf16.mxu1 %v2137_v0  ;;  %vm333_vm2 = vsmask.f32 7938  ;;  %v1876_v1 = vld [vmem:[#allocation7 + $0x38] sm:$0xff]   ;;  %vm327_vm3 = vcmask 516096   ;;  %v1878_v3 = vld [vmem:[#allocation7 + $0x30] sm:$0xff]   ;;  %v1880_v7 = vld [vmem:[#allocation7 + $0x28] sm:$0xff]  }
  0x76   : > { %1623 = vmatprep.mubr.msk.bf16.mxu0 %vm2138_vm0, %v2137_v0  ;;  %1635 = vmatprep.mubr.msk.bf16.mxu1 %vm2138_vm0, %v2137_v0  ;;  %v1877_v2 = vld [vmem:[#allocation7 + $0x18] sm:$0xff]   ;;  %v1879_v4 = vld [vmem:[#allocation7 + $0x10] sm:$0xff]   ;;  %vm2356_vm4 = vmand %vm327_vm3, %vm328_vm1  ;;  %vm349_vm6 = vsmask.f32 4368  ;;  %vm371_vm7 = vcmask 519168   ;;  %vm446_vm10 = vcmask 523264  }
  0x77   : > { %1616 = vmatpush3.bf16.msra.mxu0 %v1876_v1  ;;  %1628 = vmatpush3.bf16.msra.mxu1 %v1877_v2  ;;  %vm2361_vm5 = vmand %vm327_vm3, %vm333_vm2  ;;  %v1881_v8 = vld [vmem:[#allocation7 + $0x8] sm:$0xff]   ;;  %v1882_v9 = vld [vmem:[#allocation7 + $0x20] sm:$0xff]   ;;  %vm409_vm11 = vsmask.f32 7424  ;;  %vm571_vm12 = vcmask 1046528   ;;  %vm338_vm13 = vcmask 1040384  }
  0x78   : > { %1617 = vmatprep.subr.bf16.mxu0 %v2137_v0  ;;  %1629 = vmatprep.subr.bf16.mxu1 %v2137_v0  ;;  %v330_v10 = vld [vmem:[#allocation2] sm:$0x1]  ;;  %v335_v11 = vld [vmem:[#allocation2 + $0x8] sm:$0x1]  ;;  %v348_v15 = vld [vmem:[%s2333_s11 + $0x4] sm:$0xf] }
  0x79   : > { %v347_v12 = vld [vmem:[%s2333_s11] sm:$0xf]  ;;  %v331_v13 = vsel %vm2356_vm4, 0, %v330_v10  ;;  %v336_v14 = vsel %vm2361_vm5, 0, %v335_v11  ;;  %v360_v18 = vshrl.u32 %v348_v15, 16  ;;  %v363_v19 = vshll.u32 %v348_v15, 16  ;;  %vm2377_vm8 = vmor %vm328_vm1, %vm349_vm6 }
  0x7a   : > { %v352_v16 = vshrl.u32 %v347_v12, 16  ;;  %v355_v17 = vshll.u32 %v347_v12, 16  ;;  %332 = vst [vmem:[#allocation2] sm:$0x1] %v331_v13  ;;  %337 = vst [vmem:[#allocation2 + $0x8] sm:$0x1] %v336_v14 }
  0x7b   : > { %1618 = vmatpush3.bf16.msra.mxu0 %v1878_v3  ;;  %1630 = vmatpush3.bf16.msra.mxu1 %v1879_v4  ;;  %v1883_v20 = vld [vmem:[#allocation7] sm:$0xff]   ;;  %v362_v22 = vrot.slane %v360_v18, 7  ;;  %vm372_vm9 = vmand %vm371_vm7, %vm333_vm2  ;;  %v1886_v42 = vld [vmem:[#allocation7 + $0x58] sm:$0xff]   ;;  %s1476_s13 = sshll.u32 %s2329_s14, 4  ;;  %s1538_s8 = sshll.u32 %s2198_s25, 8 }
  0x7c   : > { %1619 = vmatprep.subr.bf16.mxu0 %v2137_v0  ;;  %1631 = vmatprep.subr.bf16.mxu1 %v2137_v0  ;;  %v354_v21 = vrot.slane %v352_v16, 7  ;;  %v1887_v45 = vld [vmem:[#allocation7 + $0x50] sm:$0xff]   ;;  %v1888_v47 = vld [vmem:[#allocation7 + $0x48] sm:$0xff]   ;;  %v1889_v49 = vld [vmem:[#allocation7 + $0x40] sm:$0xff]   ;;  %s325_s9 = scalar_lea.vmem [#allocation13], %s1476_s13  ;;  %s2594_s7 = scalar_lea.hbm %s2645_s6, %s1538_s8 }
  0x7d   : > { %v365_v26 = vor.u32 %v363_v19, %v362_v22  ;;  %v367_v27 = vrot.slane %v362_v22, 4  ;;  %v2405_v53 = vld [vmem:[#allocation12 + $0x78] sm:$0xff]  ;;  %v2407_v54 = vld [vmem:[#allocation12 + $0x70] sm:$0xff]  ;;  %v2411_v55 = vld [vmem:[#allocation12 + $0x68] sm:$0xff]  ;;  %s1349_s20 = sshll.u32 %s325_s9, 4  ;;  %s1336_s25 = scalar_lea.sflag [#allocation6], %s2329_s14  ;;  %s2596_s20 = int_to_ptr.vmem [resolvable:$true] %s1349_s20 }
  0x7e   : > { %v358_v24 = vrot.slane %v354_v21, 4  ;;  %v357_v25 = vor.u32 %v355_v17, %v354_v21  ;;  %v2417_v56 = vld [vmem:[#allocation12 + $0x60] sm:$0xff]  ;;  %v2421_v57 = vld [vmem:[#allocation12 + $0x58] sm:$0xff]  ;;  %v2425_v58 = vld [vmem:[#allocation12 + $0x50] sm:$0xff]  ;;  %s2054_s11 = scalar_lea.vmem %s2596_s20, 256  ;;  %p2675_p12 = scmp.ne.s32.totalorder %s2657_s30, 0 }
  0x7f   : > { %1620 = vmatpush3.bf16.msra.mxu0 %v1880_v7  ;;  %1632 = vmatpush3.bf16.msra.mxu1 %v1881_v8  ;;  %v2429_v59 = vld [vmem:[#allocation12 + $0x48] sm:$0xff]  ;;  %v2433_v60 = vld [vmem:[#allocation12 + $0x40] sm:$0xff]  ;;  %v2437_v61 = vld [vmem:[#allocation12 + $0x38] sm:$0xff]  ;;  %p2055_p2 = scmp.ne.s32.totalorder %s2596_s20, %s2054_s11  ;;  %s2139_s27 = smov [#allocation13]  }
  0x80   : > { %1621 = vmatprep.subr.bf16.mxu0 %v2137_v0  ;;  %1633 = vmatprep.subr.bf16.mxu1 %v2137_v0  ;;  %v366_v28 = vsel %vm2377_vm8, %v358_v24, %v365_v26  ;;  %v2441_v62 = vld [vmem:[#allocation12 + $0x30] sm:$0xff]  ;;  %v2445_v63 = vld [vmem:[#allocation12 + $0x28] sm:$0xff]  ;;  %v2448_v1 = vld [vmem:[#allocation12 + $0x20] sm:$0xff]  ;;  %s2058_s29 = sshll.u32 %s2139_s27, 4  ;;  %s2059_s29 = int_to_ptr.vmem [resolvable:$false] %s2058_s29 }
  0x81   : > { %v373_v29 = vld [vmem:[#allocation2] sm:$0xf]  ;;  %377 = vst.msk [vmem:[#allocation2 + $0x4] sm:$0xf] %vm371_vm7, %v366_v28  ;;  %v378_v30 = vld [vmem:[#allocation2 + $0x8] sm:$0x1]  ;;  %vm2455_vm14 = vmand %vm338_vm13, %vm328_vm1  ;;  %p2056_p10 = pnand %p2055_p2, %p2675_p12  ;;  %p2061_p9 = scmp.lt.s32.totalorder %s2596_s20, %s2059_s29 }
  0x82   : > { %v374_v31 = vsel %vm372_vm9, %v357_v25, %v373_v29  ;;  %v379_v32 = vsel %vm2356_vm4, %v367_v27, %v378_v30  ;;  %v2451_v2 = vld [vmem:[#allocation12 + $0x18] sm:$0xff]  ;;  %v340_v4 = vld [vmem:[#allocation3] sm:$0x1]  ;;  %vm343_vm15 = vmand %vm338_vm13, %vm333_vm2  ;;  %vm822_vm4 = vcmask 1043456   ;;  %s2060_s13 = scalar_lea.vmem %s2059_s29, 512 }
  0x83   : > { %1622 = vmatpush3.bf16.msra.mxu0 %v1882_v9  ;;  %1634 = vmatpush3.bf16.msra.mxu1 %v1883_v20  ;;  %375 = vst [vmem:[#allocation2] sm:$0xf] %v374_v31  ;;  %380 = vst [vmem:[#allocation2 + $0x8] sm:$0x1] %v379_v32  ;;  %v344_v5 = vld [vmem:[#allocation3 + $0x8] sm:$0x1]  ;;  %p2057_p7 = pneg %p2056_p10  ;;  %p2062_p13 = scmp.lt.s32.totalorder %s2060_s13, %s2054_s11 }
  0x84   : > { %1639 = vmatprep.subr.bf16.mxu0 %v2137_v0  ;;  %1651 = vmatprep.subr.mxu1 %v2137_v0  ;;  %v2463_v6 = vld [vmem:[#allocation12 + $0x10] sm:$0xff]  ;;  %v341_v7 = vsel %vm2455_vm14, 0, %v340_v4  ;;  %v345_v8 = vsel %vm343_vm15, 0, %v344_v5  ;;  %v2469_v9 = vld [vmem:[#allocation12 + $0x8] sm:$0xff]  ;;  %v2473_v10 = vld [vmem:[#allocation12] sm:$0xff] }
  0x85   : > { %342 = vst [vmem:[#allocation3] sm:$0x1] %v341_v7  ;;  %346 = vst [vmem:[#allocation3 + $0x8] sm:$0x1] %v345_v8  ;;  %v1495_v22 = vld [vmem:[#allocation9] ss:$0 sm:$0xff]  ;;  %p2063_p3 = por %p2062_p13, %p2061_p9 }
  0x86   : > { %v1896_v4 = vld [vmem:[#allocation10 + $0x20] sm:$0xff]   ;;  %v1897_v5 = vld [vmem:[#allocation10 + $0x68] sm:$0xff]   ;;  %v1898_v7 = vld [vmem:[#allocation10 + $0x18] sm:$0xff]  }
  0x87   : > { %v1899_v8 = vld [vmem:[#allocation10 + $0x60] sm:$0xff]   ;;  %vm823_vm5 = vmand %vm822_vm4, %vm333_vm2  ;;  %p2064_p5 = pnand %p2063_p3, %p2057_p7 }
  0x88   : > { %v382_v33 = vld [vmem:[#allocation2 + $0x4] sm:$0xf] }
  0x8a   : > { %v381_v34 = vld [vmem:[#allocation2] sm:$0xf]  ;;  %v1885_v36 = vld [vmem:[#allocation2 + $0x8] ss:$0 sps:$4 sm:$0x11]  }
  0x8b   : > { %v1477_v35 = vcombine.low %v381_v34, %v382_v33  ;;  %v418_v39 = vshll.u32 %v1885_v36, 16  ;;  %v558_v46 = vld [vmem:[#allocation2] sm:$0xe]  ;;  %v573_v51 = vrot.slane %v1885_v36, 1 }
  0x8c   : > { %v1489_v48 = vcombine.low %v558_v46, %v382_v33 }
  0x8d   : > { %v411_v37 = vshrl.u32 %v1477_v35, 16  ;;  %v413_v38 = vshll.u32 %v1477_v35, 16  ;;  %1636 = vmatmul.mubr.msk.bf16.vlgmr.msra.gmra.mxu1 %vm446_vm10, %v1477_v35  ;;  %v420_v41 = vrot.slane %v418_v39, 1 }
  0x8e   : > { %1683 = vmatprep.mubr.msk.f32.mxu1 %vm2138_vm0, %v2137_v0  ;;  %v572_v50 = vrot.slane %v1489_v48, 1  ;;  %1652 = vmatpush3.msra.mxu1 %v2405_v53  ;;  %v1891_v48 = vld [vmem:[#allocation10 + $0x38] sm:$0xff]  }
  0x8f   : > { %v415_v40 = vrot.slane %v413_v38, 1  ;;  %1653 = vmatprep.subr.mxu1 %v2137_v0 }
  0x90   : > { %v574_v52 = vsel %vm571_vm12, %v572_v50, %v573_v51  ;;  %1654 = vmatpush3.msra.mxu1 %v2407_v54  ;;  %v1893_v50 = vld [vmem:[#allocation10 + $0x78] sm:$0xff]   ;;  %v1894_v51 = vld [vmem:[#allocation10 + $0x28] sm:$0xff]  }
  0x91   : > { %v416_v43 = vor.u32 %v415_v40, %v411_v37  ;;  %1655 = vmatprep.subr.mxu1 %v2137_v0 }
  0x92   : > { %1656 = vmatpush3.msra.mxu1 %v2411_v55 }
  0x93   : > { %v421_v44 = vsel %vm409_vm11, %v416_v43, %v420_v41  ;;  %1657 = vmatprep.subr.mxu1 %v2137_v0 }
  0x94   : > { %1624 = vmatmul.mubr.msk.bf16.vlgmr.msra.gmra.mxu0 %vm446_vm10, %v421_v44  ;;  %1658 = vmatpush3.msra.mxu1 %v2417_v56 }
  0x95   : > { %1640 = vmatpush3.bf16.msra.mxu0 %v1886_v42  ;;  %1647 = vmatprep.mubr.msk.bf16.mxu0 %vm2138_vm0, %v2137_v0 }
  0x96   : > { %1641 = vmatprep.subr.bf16.mxu0 %v2137_v0  ;;  %1659 = vmatprep.subr.mxu1 %v2137_v0 }
  0x97   : > { %1660 = vmatpush3.msra.mxu1 %v2421_v57 }
  0x98   : > { %1661 = vmatprep.subr.mxu1 %v2137_v0 }
  0x99   : > { %1642 = vmatpush3.bf16.msra.mxu0 %v1887_v45  ;;  %1662 = vmatpush3.msra.mxu1 %v2425_v58 }
  0x9a   : > { %1643 = vmatprep.subr.bf16.mxu0 %v2137_v0  ;;  %1663 = vmatprep.subr.mxu1 %v2137_v0 }
  0x9b   : > { %1664 = vmatpush3.msra.mxu1 %v2429_v59 }
  0x9c   : > { %1665 = vmatprep.subr.mxu1 %v2137_v0 }
  0x9d   : > { %1644 = vmatpush3.bf16.msra.mxu0 %v1888_v47  ;;  %1666 = vmatpush3.msra.mxu1 %v2433_v60 }
  0x9e   : > { %1645 = vmatprep.subr.bf16.mxu0 %v2137_v0  ;;  %1667 = vmatprep.subr.mxu1 %v2137_v0 }
  0x9f   : > { %1668 = vmatpush3.msra.mxu1 %v2437_v61 }
  0xa0   : > { %1669 = vmatprep.subr.mxu1 %v2137_v0 }
  0xa1   : > { %1646 = vmatpush3.bf16.msra.mxu0 %v1889_v49  ;;  %1670 = vmatpush3.msra.mxu1 %v2441_v62  ;;  %v1892_v49 = vld [vmem:[#allocation10 + $0x30] sm:$0xff]  }
  0xa2   : > { %1686 = vmatprep.subr.bf16.mxu0 %v2137_v0  ;;  %1671 = vmatprep.subr.mxu1 %v2137_v0 }
  0xa3   : > { %1672 = vmatpush3.msra.mxu1 %v2445_v63 }
  0xa4   : > { %1648 = vmatmul.mubr.msk.bf16.vlgmr.msra.gmra.mxu0 %vm446_vm10, %v574_v52  ;;  %1673 = vmatprep.subr.mxu1 %v2137_v0  ;;  %v1895_v52 = vld [vmem:[#allocation10 + $0x70] sm:$0xff]  }
  0xa5   : > { %1702 = vmatprep.mubr.msk.bf16.mxu0 %vm2138_vm0, %v2137_v0  ;;  %1674 = vmatpush3.msra.mxu1 %v2448_v1 }
  0xa6   : > { %1675 = vmatprep.subr.mxu1 %v2137_v0  ;;  %1687 = vmatpush3.bf16.msra.mxu0 %v1893_v50 }
  0xa7   : > { %1676 = vmatpush3.msra.mxu1 %v2451_v2  ;;  %1688 = vmatprep.subr.bf16.mxu0 %v2137_v0 }
  0xa8   : > { %1677 = vmatprep.subr.mxu1 %v2137_v0 }
  0xa9   : > { %1678 = vmatpush3.msra.mxu1 %v2463_v6 }
  0xaa   : > { %1679 = vmatprep.subr.mxu1 %v2137_v0  ;;  %1689 = vmatpush3.bf16.msra.mxu0 %v1895_v52 }
  0xab   : > { %1680 = vmatpush3.msra.mxu1 %v2469_v9  ;;  %1690 = vmatprep.subr.bf16.mxu0 %v2137_v0 }
  0xac   : > { %1681 = vmatprep.subr.mxu1 %v2137_v0 }
  0xad   : > { %1682 = vmatpush3.msra.mxu1 %v2473_v10 }
  0xae   : > { %1706 = vmatprep.subr.bf16.mxu1 %v2137_v0  ;;  %1691 = vmatpush3.bf16.msra.mxu0 %v1897_v5 }
  0xaf   : > { %1692 = vmatprep.subr.bf16.mxu0 %v2137_v0 }
  0xb2   : > { %1693 = vmatpush3.bf16.msra.mxu0 %v1899_v8  ;;  %v828_v8 = vld [vmem:[#allocation3 + $0x8] sm:$0x1] }
  0xb3   : > { %1694 = vmatprep.subr.bf16.mxu0 %v2137_v0 }
 0x14d   : > { %v551_v11 = vpop.f32.mrf.mxu1 }
 0x14f   : > { %v1637_v12 = vpop.f32.mrf.mxu1 }
 0x150   : > { %v1901_v12 = vld [vmem:[#allocation10 + $0x58] sm:$0xff]  }
 0x151   : > { %v554_v13 = vpop.f32.mrf.mxu1  ;;  %1695 = vmatpush3.bf16.msra.mxu0 %v1901_v12 }
 0x152   : > { %1696 = vmatprep.subr.bf16.mxu0 %v2137_v0 }
 0x153   : > { %v1638_v14 = vpop.f32.mrf.mxu1 }
 0x154   : > { %v484_v15 = vpop.f32.mrf.mxu0  ;;  %v1903_v14 = vld [vmem:[#allocation10 + $0x50] sm:$0xff]  }
 0x155   : > { %v552_v19 = vadd.f32 %v551_v11, %v484_v15  ;;  %v1900_v11 = vld [vmem:[#allocation10 + $0x10] sm:$0xff]   ;;  %v1904_v15 = vld [vmem:[#allocation10] sm:$0xff]   ;;  %1697 = vmatpush3.bf16.msra.mxu0 %v1903_v14 }
 0x156   : > { %v1625_v16 = vpop.f32.mrf.mxu0  ;;  %1698 = vmatprep.subr.bf16.mxu0 %v2137_v0 }
 0x157   : > { %v1905_v16 = vld [vmem:[#allocation10 + $0x48] sm:$0xff]  }
 0x158   : > { %v487_v17 = vpop.f32.mrf.mxu0 }
 0x159   : > { %v555_v25 = vadd.f32 %v554_v13, %v487_v17  ;;  %v1902_v13 = vld [vmem:[#allocation10 + $0x8] sm:$0xff]   ;;  %1699 = vmatpush3.bf16.msra.mxu0 %v1905_v16  ;;  %v1907_v17 = vld [vmem:[#allocation10 + $0x40] sm:$0xff]  }
 0x15a   : > { %v1626_v18 = vpop.f32.mrf.mxu0  ;;  %1700 = vmatprep.subr.bf16.mxu0 %v2137_v0 }
 0x15d   : > { %1701 = vmatpush3.bf16.msra.mxu0 %v1907_v17 }
 0x15e   : > { %1726 = vmatprep.subr.bf16.mxu0 %v2137_v0 }
 0x164   : > { %v636_v20 = vpop.f32.mrf.mxu0 }
 0x165   : > { %v643_v21 = vadd.f32 %v636_v20, %v552_v19 }
 0x166   : > { %v1649_v24 = vpop.f32.mrf.mxu0 }
 0x167   : > { %v2479_v27 = vadd.f32 %v1495_v22, %v643_v21 }
 0x168   : > { %v639_v26 = vpop.f32.mrf.mxu0 }
 0x169   : > { %v644_v28 = vadd.f32 %v639_v26, %v555_v25  ;;  %v659_v31 = vmul.f32 %v2479_v27, %v2479_v27  ;;  %v764_v26 = vlaneseq }
 0x16a   : > { %v1650_v29 = vpop.f32.mrf.mxu0 }
 0x16b   : > { %v2481_v30 = vadd.f32 %v1495_v22, %v644_v28  ;;  %v2508_v28 = vshrl.u32 %v764_v26, 7 }
 0x16d   : > { %v652_v32 = vadd.f32 %v2481_v30, %v2479_v27  ;;  %v660_v33 = vmul.f32 %v2481_v30, %v2481_v30  ;;  %v766_v29 = vsub.s32 0, %v2508_v28 }
 0x16f   : > { %v653_v34 = vrot.slane %v652_v32, 4  ;;  %v661_v35 = vadd.f32 %v660_v33, %v659_v31 }
 0x171   : > { %v654_v36 = vadd.f32 %v653_v34, %v652_v32  ;;  %v662_v37 = vrot.slane %v661_v35, 4  ;;  %v772_v32 = vsub.s32 1, %v2508_v28 }
 0x173   : > { %v655_v38 = vrot.slane %v654_v36, 2  ;;  %v663_v39 = vadd.f32 %v662_v37, %v661_v35  ;;  %v1496_v37 = vld [vmem:[#allocation9 + $0x1] ss:$0 sm:$0xff] }
 0x175   : > { %v656_v40 = vadd.f32 %v655_v38, %v654_v36  ;;  %v664_v41 = vrot.slane %v663_v39, 2 }
 0x177   : > { %v657_v42 = vrot.slane %v656_v40, 1  ;;  %v665_v43 = vadd.f32 %v664_v41, %v663_v39 }
 0x179   : > { %v666_v44 = vrot.slane %v665_v43, 1  ;;  %v658_v45 = vadd.f32 %v657_v42, %v656_v40  ;;  %v1497_v40 = vld [vmem:[#allocation9 + $0x2] ss:$0 sm:$0xff] }
 0x17b   : > { %v667_v46 = vadd.f32 %v666_v44, %v665_v43 }
 0x17d   : > { %v669_v47 = vsel %vm338_vm13, %v658_v45, %v667_v46 }
 0x17e   : > { %1684 = vmatmul.mubr.f32.vlgmr.msra.gmra.mxu1 %v669_v47 }
 0x17f   : > { %1722 = vmatprep.mubr.msk.bf16.mxu1 %vm2138_vm0, %v2137_v0  ;;  %1707 = vmatpush3.bf16.msra.mxu1 %v1891_v48 }
 0x180   : > { %1708 = vmatprep.subr.bf16.mxu1 %v2137_v0 }
 0x183   : > { %1709 = vmatpush3.bf16.msra.mxu1 %v1892_v49 }
 0x184   : > { %1710 = vmatprep.subr.bf16.mxu1 %v2137_v0 }
 0x187   : > { %1711 = vmatpush3.bf16.msra.mxu1 %v1894_v51 }
 0x188   : > { %1712 = vmatprep.subr.bf16.mxu1 %v2137_v0 }
 0x18b   : > { %1713 = vmatpush3.bf16.msra.mxu1 %v1896_v4 }
 0x18c   : > { %1714 = vmatprep.subr.bf16.mxu1 %v2137_v0 }
 0x18f   : > { %1715 = vmatpush3.bf16.msra.mxu1 %v1898_v7  ;;  %v824_v7 = vld [vmem:[#allocation3] sm:$0xf] }
 0x190   : > { %1716 = vmatprep.subr.bf16.mxu1 %v2137_v0 }
 0x193   : > { %1717 = vmatpush3.bf16.msra.mxu1 %v1900_v11 }
 0x194   : > { %1718 = vmatprep.subr.bf16.mxu1 %v2137_v0 }
 0x197   : > { %1719 = vmatpush3.bf16.msra.mxu1 %v1902_v13 }
 0x198   : > { %1720 = vmatprep.subr.bf16.mxu1 %v2137_v0 }
 0x19b   : > { %1721 = vmatpush3.bf16.msra.mxu1 %v1904_v15 }
 0x19c   : > { %1746 = vmatprep.subr.mxu1 %v2137_v0 }
 0x23e   : > { %v752_v18 = vpop.f32.mrf.mxu1 }
 0x23f   : > { %v756_v19 = vmul.f32 %v752_v18, %v752_v18  ;;  %v767_v31 = vrot.slane %v752_v18, %v766_v29 }
 0x240   : > { %v1685_v20 = vpop.f32.mrf.mxu1 }
 0x241   : > { %v758_v21 = vrot.slane %v756_v19, 7  ;;  %v768_v34 = vsub.f32 %v2479_v27, %v767_v31  ;;  %v769_v35 = vsub.f32 %v2481_v30, %v767_v31  ;;  %v1909_v31 = vld [vmem:[#allocation10 + $0xb8] sm:$0xff]  }
 0x243   : > { %v760_v22 = vsub.f32 %v752_v18, %v758_v21 }
 0x245   : > { %v761_v24 = vmax.f32 %v760_v22, 0.0 }
 0x247   : > { %v762_v25 = vadd.f32 1e-05, %v761_v24 }
 0x249   : > { %1918 = vrsqrt.f32 %v762_v25 }
 0x256   : > { %v1919_v33 = vpop.eup %1918 }
 0x257   : > { %v773_v36 = vrot.slane %v1919_v33, %v772_v32 }
 0x259   : > { %v774_v38 = vmul.f32 %v773_v36, %v768_v34  ;;  %v775_v39 = vmul.f32 %v773_v36, %v769_v35 }
 0x25b   : > { %v781_v41 = vmul.f32 %v1496_v37, %v774_v38  ;;  %v782_v42 = vmul.f32 %v1496_v37, %v775_v39 }
 0x25d   : > { %v788_v43 = vadd.f32 %v1497_v40, %v781_v41  ;;  %v789_v44 = vadd.f32 %v1497_v40, %v782_v42 }
 0x25f   : > { %vm790_vm1 = vcmp.ge.f32.partialorder %v788_v43, 0.0  ;;  %vm791_vm3 = vcmp.ge.f32.partialorder %v789_v44, 0.0  ;;  %v792_v45 = vmul.f32 0.2, %v788_v43  ;;  %v793_v46 = vmul.f32 0.2, %v789_v44 }
 0x261   : > { %v794_v47 = vsel %vm790_vm1, %v788_v43, %v792_v45  ;;  %v795_v48 = vsel %vm791_vm3, %v789_v44, %v793_v46 }
 0x262   : > { %v1536_v27 = vpack.c.bf16 %v794_v47, %v794_v47  ;;  %v1537_v49 = vpack.c.bf16 %v795_v48, %v795_v48 }
 0x264   : > { %v803_v30 = vshrl.u32 %v1536_v27, 16  ;;  %v811_v50 = vshrl.u32 %v1537_v49, 16  ;;  %v806_v52 = vshll.u32 %v1536_v27, 16  ;;  %v814_v5 = vshll.u32 %v1537_v49, 16 }
 0x266   : > { %v805_v51 = vrot.slane %v803_v30, 7  ;;  %v813_v4 = vrot.slane %v811_v50, 7 }
 0x268   : > { %v808_v11 = vor.u32 %v806_v52, %v805_v51  ;;  %v809_v12 = vrot.slane %v805_v51, 4  ;;  %v816_v13 = vor.u32 %v814_v5, %v813_v4  ;;  %v818_v14 = vrot.slane %v813_v4, 4 }
 0x26a   : > { %v817_v15 = vsel %vm2377_vm8, %v809_v12, %v816_v13  ;;  %v825_v16 = vsel %vm823_vm5, %v808_v11, %v824_v7  ;;  %v829_v17 = vsel %vm2455_vm14, %v818_v14, %v828_v8 }
 0x26b   : > { %826 = vst [vmem:[#allocation3] sm:$0xf] %v825_v16  ;;  %827 = vst [vmem:[#allocation3 + $0x4] sm:$0xf] %v817_v15 }
 0x26c   : > { %830 = vst [vmem:[#allocation3 + $0x8] sm:$0x1] %v829_v17 }
 0x272   : > { %v831_v18 = vld [vmem:[#allocation3] sm:$0xf]  ;;  %v2523_v19 = vld [vmem:[#allocation3 + $0x4] sm:$0xf] }
 0x273   : > { %v1500_v20 = vcombine.low %v831_v18, %v2523_v19  ;;  %v2526_v21 = vld [vmem:[#allocation3 + $0x8] ss:$0 sps:$4 sm:$0x11]  }
 0x274   : > { %v883_v24 = vshll.u32 %v2526_v21, 16 }
 0x275   : > { %1723 = vmatmul.mubr.bf16.vlgmr.msra.gmra.mxu1 %v1500_v20  ;;  %v878_v22 = vshll.u32 %v1500_v20, 16  ;;  %v876_v23 = vshrl.u32 %v1500_v20, 16 }
 0x276   : > { %1747 = vmatpush3.msra.mxu1 %v2405_v53  ;;  %1778 = vmatprep.mubr.msk.f32.mxu1 %vm2138_vm0, %v2137_v0  ;;  %v885_v26 = vrot.slane %v883_v24, 1  ;;  %v1910_v53 = vld [vmem:[#allocation10 + $0xb0] sm:$0xff]  }
 0x277   : > { %v880_v3 = vrot.slane %v878_v22, 1  ;;  %1748 = vmatprep.subr.mxu1 %v2137_v0 }
 0x278   : > { %1749 = vmatpush3.msra.mxu1 %v2407_v54  ;;  %v1911_v54 = vld [vmem:[#allocation10 + $0xa8] sm:$0xff]  }
 0x279   : > { %v881_v25 = vor.u32 %v880_v3, %v876_v23  ;;  %1750 = vmatprep.subr.mxu1 %v2137_v0 }
 0x27a   : > { %1751 = vmatpush3.msra.mxu1 %v2411_v55  ;;  %v1912_v55 = vld [vmem:[#allocation10 + $0xa0] sm:$0xff]  }
 0x27b   : > { %v886_v33 = vsel %vm409_vm11, %v881_v25, %v885_v26  ;;  %1752 = vmatprep.subr.mxu1 %v2137_v0 }
 0x27c   : > { %1703 = vmatmul.mubr.bf16.vlgmr.msra.gmra.mxu0 %v886_v33  ;;  %1753 = vmatpush3.msra.mxu1 %v2417_v56  ;;  %v1913_v56 = vld [vmem:[#allocation10 + $0x98] sm:$0xff]   ;;  %v1528_v33 = vld [vmem:[%s2643_s4 + $0x1] ss:$0 sm:$0xff] }
 0x27d   : > { %1727 = vmatpush3.bf16.msra.mxu0 %v1909_v31  ;;  %1742 = vmatprep.mubr.msk.bf16.mxu0 %vm2138_vm0, %v2137_v0 }
 0x27e   : > { %1728 = vmatprep.subr.bf16.mxu0 %v2137_v0  ;;  %1754 = vmatprep.subr.mxu1 %v2137_v0 }
 0x27f   : > { %1755 = vmatpush3.msra.mxu1 %v2421_v57  ;;  %v1914_v57 = vld [vmem:[#allocation10 + $0x90] sm:$0xff]  }
 0x280   : > { %1756 = vmatprep.subr.mxu1 %v2137_v0 }
 0x281   : > { %1729 = vmatpush3.bf16.msra.mxu0 %v1910_v53  ;;  %1757 = vmatpush3.msra.mxu1 %v2425_v58  ;;  %v1067_v58 = vld [vmem:[#allocation3] sm:$0xe] }
 0x282   : > { %1730 = vmatprep.subr.bf16.mxu0 %v2137_v0  ;;  %1758 = vmatprep.subr.mxu1 %v2137_v0 }
 0x283   : > { %1759 = vmatpush3.msra.mxu1 %v2429_v59  ;;  %v1915_v59 = vld [vmem:[#allocation10 + $0x88] sm:$0xff]  }
 0x284   : > { %1760 = vmatprep.subr.mxu1 %v2137_v0 }
 0x285   : > { %1731 = vmatpush3.bf16.msra.mxu0 %v1911_v54  ;;  %1761 = vmatpush3.msra.mxu1 %v2433_v60  ;;  %v1518_v60 = vcombine.low %v1067_v58, %v2523_v19 }
 0x286   : > { %1732 = vmatprep.subr.bf16.mxu0 %v2137_v0  ;;  %1762 = vmatprep.subr.mxu1 %v2137_v0 }
 0x287   : > { %1763 = vmatpush3.msra.mxu1 %v2437_v61  ;;  %v1916_v61 = vld [vmem:[#allocation10 + $0x80] sm:$0xff]  }
 0x288   : > { %1764 = vmatprep.subr.mxu1 %v2137_v0 }
 0x289   : > { %1733 = vmatpush3.bf16.msra.mxu0 %v1912_v55  ;;  %1765 = vmatpush3.msra.mxu1 %v2441_v62  ;;  %v1088_v62 = vrot.slane %v1518_v60, 1  ;;  %v1529_v55 = vld [vmem:[%s2643_s4 + $0x2] ss:$0 sm:$0xff] }
 0x28a   : > { %1734 = vmatprep.subr.bf16.mxu0 %v2137_v0  ;;  %1766 = vmatprep.subr.mxu1 %v2137_v0 }
 0x28b   : > { %1767 = vmatpush3.msra.mxu1 %v2445_v63  ;;  %v1089_v63 = vrot.slane %v2526_v21, 1 }
 0x28c   : > { %1768 = vmatprep.subr.mxu1 %v2137_v0 }
 0x28d   : > { %1735 = vmatpush3.bf16.msra.mxu0 %v1913_v56  ;;  %1769 = vmatpush3.msra.mxu1 %v2448_v1  ;;  %v1090_v1 = vsel %vm571_vm12, %v1088_v62, %v1089_v63 }
 0x28e   : > { %1736 = vmatprep.subr.bf16.mxu0 %v2137_v0  ;;  %1770 = vmatprep.subr.mxu1 %v2137_v0 }
 0x28f   : > { %1771 = vmatpush3.msra.mxu1 %v2451_v2 }
 0x290   : > { %1772 = vmatprep.subr.mxu1 %v2137_v0 }
 0x291   : > { %1737 = vmatpush3.bf16.msra.mxu0 %v1914_v57  ;;  %1773 = vmatpush3.msra.mxu1 %v2463_v6 }
 0x292   : > { %1738 = vmatprep.subr.bf16.mxu0 %v2137_v0  ;;  %1774 = vmatprep.subr.mxu1 %v2137_v0 }
 0x293   : > { %1775 = vmatpush3.msra.mxu1 %v2469_v9 }
 0x294   : > { %1776 = vmatprep.subr.mxu1 %v2137_v0 }
 0x295   : > { %1739 = vmatpush3.bf16.msra.mxu0 %v1915_v59  ;;  %1777 = vmatpush3.msra.mxu1 %v2473_v10 }
 0x296   : > { %1740 = vmatprep.subr.bf16.mxu0 %v2137_v0  ;;  %v1527_v0 = vld [vmem:[%s2643_s4] ss:$0 sm:$0xff] }
 0x299   : > { %1741 = vmatpush3.bf16.msra.mxu0 %v1916_v61 }
 0x29c   : > { %1743 = vmatmul.mubr.bf16.vlgmr.msra.gmra.mxu0 %v1090_v1 }
 0x335   : > { %v1060_v2 = vpop.f32.mrf.mxu1 }
 0x337   : > { %v1724_v6 = vpop.f32.mrf.mxu1 }
 0x339   : > { %v1063_v34 = vpop.f32.mrf.mxu1 }
 0x33b   : > { %v1725_v35 = vpop.f32.mrf.mxu1 }
 0x33c   : > { %v970_v9 = vpop.f32.mrf.mxu0 }
 0x33d   : > { %v1061_v39 = vadd.f32 %v1060_v2, %v970_v9 }
 0x33e   : > { %v1704_v36 = vpop.f32.mrf.mxu0 }
 0x340   : > { %v973_v37 = vpop.f32.mrf.mxu0 }
 0x341   : > { %v1064_v42 = vadd.f32 %v1063_v34, %v973_v37 }
 0x342   : > { %v1705_v38 = vpop.f32.mrf.mxu0 }
 0x35c   : > { %v1174_v40 = vpop.f32.mrf.mxu0 }
 0x35d   : > { %v1181_v10 = vadd.f32 %v1174_v40, %v1061_v39 }
 0x35e   : > { %v1744_v41 = vpop.f32.mrf.mxu0 }
 0x35f   : > { %v1188_v44 = vadd.f32 %v1527_v0, %v1181_v10 }
 0x360   : > { %v1177_v43 = vpop.f32.mrf.mxu0 }
 0x361   : > { %v1182_v45 = vadd.f32 %v1177_v43, %v1064_v42  ;;  %v1197_v48 = vmul.f32 %v1188_v44, %v1188_v44 }
 0x362   : > { %v1745_v46 = vpop.f32.mrf.mxu0 }
 0x363   : > { %v1189_v47 = vadd.f32 %v1527_v0, %v1182_v45 }
 0x365   : > { %v1190_v27 = vadd.f32 %v1189_v47, %v1188_v44  ;;  %v1198_v49 = vmul.f32 %v1189_v47, %v1189_v47 }
 0x367   : > { %v1191_v30 = vrot.slane %v1190_v27, 4  ;;  %v1199_v50 = vadd.f32 %v1198_v49, %v1197_v48 }
 0x369   : > { %v1192_v51 = vadd.f32 %v1191_v30, %v1190_v27  ;;  %v1200_v52 = vrot.slane %v1199_v50, 4 }
 0x36b   : > { %v1193_v4 = vrot.slane %v1192_v51, 2  ;;  %v1201_v5 = vadd.f32 %v1200_v52, %v1199_v50 }
 0x36d   : > { %v1194_v7 = vadd.f32 %v1193_v4, %v1192_v51  ;;  %v1202_v8 = vrot.slane %v1201_v5, 2 }
 0x36f   : > { %v1195_v11 = vrot.slane %v1194_v7, 1  ;;  %v1203_v12 = vadd.f32 %v1202_v8, %v1201_v5 }
 0x371   : > { %v1204_v13 = vrot.slane %v1203_v12, 1  ;;  %v1196_v14 = vadd.f32 %v1195_v11, %v1194_v7 }
 0x373   : > { %v1205_v15 = vadd.f32 %v1204_v13, %v1203_v12 }
 0x375   : > { %v1206_v16 = vsel %vm338_vm13, %v1196_v14, %v1205_v15 }
 0x376   : > { %1779 = vmatmul.mubr.f32.vlgmr.msra.gmra.mxu1 %v1206_v16 }
 0x436   : > { %v1289_v17 = vpop.f32.mrf.mxu1 }
 0x437   : > { %v1293_v18 = vmul.f32 %v1289_v17, %v1289_v17  ;;  %v1304_v23 = vrot.slane %v1289_v17, %v766_v29 }
 0x438   : > { %v1780_v19 = vpop.f32.mrf.mxu1 }
 0x439   : > { %v1295_v20 = vrot.slane %v1293_v18, 7  ;;  %v1305_v25 = vsub.f32 %v1188_v44, %v1304_v23  ;;  %v1306_v26 = vsub.f32 %v1189_v47, %v1304_v23 }
 0x43b   : > { %v1297_v21 = vsub.f32 %v1289_v17, %v1295_v20 }
 0x43d   : > { %v1298_v22 = vmax.f32 %v1297_v21, 0.0 }
 0x43f   : > { %v1299_v24 = vadd.f32 1e-05, %v1298_v22 }
 0x441   : > { %1920 = vrsqrt.f32 %v1299_v24 }
 0x44e   : > { %v1921_v3 = vpop.eup %1920 }
 0x44f   : > { %v1310_v31 = vrot.slane %v1921_v3, %v772_v32 }
 0x451   : > { %v1311_v53 = vmul.f32 %v1310_v31, %v1305_v25  ;;  %v1312_v54 = vmul.f32 %v1310_v31, %v1306_v26 }
 0x453   : > { %v1318_v56 = vmul.f32 %v1528_v33, %v1311_v53  ;;  %v1319_v57 = vmul.f32 %v1528_v33, %v1312_v54 }
 0x455   : > { %v1325_v29 = vadd.f32 %v1529_v55, %v1318_v56  ;;  %v1326_v28 = vadd.f32 %v1529_v55, %v1319_v57 }
 0x457   : > { %vm1327_vm0 = vcmp.ge.f32.partialorder %v1325_v29, 0.0  ;;  %vm1328_vm2 = vcmp.ge.f32.partialorder %v1326_v28, 0.0  ;;  %v1329_v32 = vmul.f32 0.2, %v1325_v29  ;;  %v1330_v58 = vmul.f32 0.2, %v1326_v28 }
 0x459   : > { %v1331_v59 = vsel %vm1327_vm0, %v1325_v29, %v1329_v32  ;;  %v1332_v60 = vsel %vm1328_vm2, %v1326_v28, %v1330_v58 }
 0x45a   : > { %1333 = vst [vmem:[%s325_s9] sm:$0xff] %v1331_v59  ;;  %1334 = vst [vmem:[%s325_s9 + $0x8] sm:$0xff] %v1332_v60 }
 0x45b   : > { %2067 = shalt.err (!%p2064_p5)
}
 0x45c   : > { %s2068_s16 = scalar_lea.hbm %s2594_s7, 256  ;;  %s2072_s12 = scalar_lea.hbm %s2645_s6, 512 }
 0x45d   : > { %p2069_p6 = scmp.ne.s32.totalorder %s2594_s7, %s2068_s16  ;;  %p2073_p1 = scmp.lt.s32.totalorder %s2594_s7, %s2645_s6 }
 0x45e   : > { %p2074_p11 = scmp.lt.s32.totalorder %s2072_s12, %s2068_s16 }
 0x45f   : > { %p2070_p4 = pnand %p2069_p6, %p2675_p12 }
 0x460   : > { %p2075_p0 = por %p2074_p11, %p2073_p1 }
 0x461   : > { %p2071_p8 = pneg %p2070_p4 }
 0x463   : > { %p2076_p2 = pnand %p2075_p0, %p2071_p8 }
 0x465   : > { %2079 = shalt.err (!%p2076_p2)
}
 0x466   : > { %s2140_s10 = smov 128   ;;  %s2141_s15 = smov 8  }
 0x467   : > { %1799 = dma.vmem_to_hbm [thread:$0]  (%p2675_p12), %s2596_s20, 256, %s2594_s7, %s1336_s25, %s2140_s10, %s2140_s10, %s2141_s15  }
 0x468 PF: > { %s1364_s11 = sand.u32 1, %s2114_s21   ;;  %p2676_p10 = scmp.ne.s32.totalorder %s2653_s28, 0 }
 0x469   : > { %p2677_p7 = scmp.ge.s32.totalorder %s2126_s24, 2  ;;  %s1365_s27 = scalar_lea.sflag [#allocation6], %s1364_s11 }
 0x46b   : > { %p1819_p9 = pnand %p2677_p7, %p2676_p10 }
 0x46d   : > { %p1820_p13 = pneg %p1819_p9 }
 0x46f   : > { %2109 = dma.done.wait (%p1820_p13), %s1365_s27, 256  }
 0x470   : > { %2111 = vsyncadd (%p1820_p13), %s1365_s27, 4294967040  ;;  %p21_p3 = scmp.ge.s32.totalorder %s2271_s18, 4   ;;  %s2678_s21 = smov %s2118_s22 }
 0x471   : > { %s2679_s22 = smov %s2122_s23  ;;  %s2680_s23 = smov %s2280_s26 }
 0x472   : > { %s2681_s24 = smov %s2271_s18  ;;  %23 = sbr.rel (!%p21_p3) target bundleno = 7 (0x7), region = 109 }
 0x477   :  { %1370 = vsyncpa [#allocation5], 1 }
 0x478   :  { %1372 = vsyncpa [#allocation5 + $0x1], 1 }
 0x479   :  { %1373 = vsyncpa [#allocation8], 1 }
 0x47a   :  { %1374 = vsyncpa [#allocation11], 1 }
 0x47b   :  { %1375 = vsyncpa [#allocation6], 1 }
 0x47c   :  { %1377 = vsyncpa [#allocation6 + $0x1], 1 }

</bundles_post_ra>
